<compile_context>
chip_gen: v7x
topology: tpu7x:2x2x1
jax: 0.10.0
libtpu: 0.0.40
codegen_flags: <defaults>
</compile_context>

<pallas_src>
import numpy as np
import jax
import jax.numpy as jnp
from jax.experimental import pallas as pl
from jax.experimental.pallas import tpu as pltpu


# ----------------------------------------------------------------------------
# Kernels
# ----------------------------------------------------------------------------
def _nin_kernel_simple(x_ref, wt_ref, b_ref, o_ref):
    # x_ref:  (1, C, TS)   activation slab (spatial in the lane dim)
    # wt_ref: (O, C)       pre-transposed weight (resident: constant index_map)
    # b_ref:  (O, 1)       bias column (broadcast over lanes)
    # o_ref:  (1, O, TS)
    y = jnp.dot(wt_ref[...], x_ref[0], preferred_element_type=jnp.float32)
    o_ref[0] = (y + b_ref[...]).astype(o_ref.dtype)


def _nin_kernel_acc(x_ref, wt_ref, b_ref, o_ref, acc_ref):
    # Large-C path: K(=C) reduction axis is the last grid dim ("arbitrary").
    # x_ref: (1, TK, TS)  wt_ref: (O, TK)  b_ref: (O, 1)  o_ref: (1, O, TS)
    # acc_ref: (O, TS) f32 scratch, resident across the K axis.
    k = pl.program_id(2)

    @pl.when(k == 0)
    def _():
        acc_ref[...] = jnp.zeros_like(acc_ref)

    acc_ref[...] += jnp.dot(wt_ref[...], x_ref[0],
                            preferred_element_type=jnp.float32)

    @pl.when(k == pl.num_programs(2) - 1)
    def _():
        o_ref[0] = (acc_ref[...] + b_ref[...]).astype(o_ref.dtype)


# ----------------------------------------------------------------------------
# Tiling
# ----------------------------------------------------------------------------
def _round_up(x, m):
    return ((x + m - 1) // m) * m


def _physical_vmem_bytes():
    """Per-core VMEM; conservative (v7x = 64 MiB) fallback if query fails."""
    try:
        return int(pltpu.get_tpu_info().vmem_capacity_bytes)
    except Exception:
        return 64 * 1024 * 1024


def _choose_tiles(S, C, O, B):
    """Pick (TS, TK, vmem_limit_bytes) from a per-generation VMEM byte budget."""
    phys = _physical_vmem_bytes()
    # Target ~1/3 of physical VMEM for pipeline buffers, capped at 32 MiB.
    budget = max(4 << 20, min(phys // 3, 32 << 20))

    # K (=C) tiling: keep full C unless it gets large; then pick an
    # MXU-aligned (multiple of 256) EXACT divisor so padded-K garbage can
    # never enter the reduction.
    TK = C
    if C > 512:
        tk = (min(C, 1024) // 256) * 256
        while tk >= 256:
            if C % tk == 0:
                TK = tk
                break
            tk -= 256

    # Sublane-padded byte model (f32, default 2-deep pipelining per block).
    Cp = _round_up(TK, 8)
    Op = _round_up(O, 8)
    fixed = 2 * 4 * Op * _round_up(TK, 128)   # weight (O, TK) x 2 buffers
    fixed += 2 * 4 * Op * 128                 # bias (O, 1) x 2 buffers
    per_ts = 2 * 4 * Cp + 2 * 4 * Op + 4 * Op  # x x2 + out x2 + f32 acc scratch

    max_ts = (budget - fixed) // per_ts
    max_ts = max(128, (max_ts // 128) * 128)

    S_pad = _round_up(S, 128)
    TS = min(max_ts, S_pad)
    if TS >= S:
        TS = S  # single full-S block (full-dim block shape is always legal)
        # Megacore (v7x has 2 TCs): make sure the parallel grid has >= 2 steps.
        if B == 1 and S >= 256:
            TS = _round_up(pl.cdiv(S, 2), 128)

    need = fixed + per_ts * TS
    vmem_limit = min(phys, max(32 << 20, need + (8 << 20)))
    return TS, TK, vmem_limit


# ----------------------------------------------------------------------------
# Wrapper
# ----------------------------------------------------------------------------
def nin_forward(x, W, b):
    """x: (B, C, H, W) f32, W: (C, O) f32, b: (1, O, 1, 1) f32 -> (B, O, H, W)."""
    B, C, H, Wd = x.shape
    O = W.shape[1]
    S = H * Wd

    # Free layout plumbing (no transposes of the activation tensor).
    x3 = x.reshape(B, C, S)   # contiguous NCHW -> (B, C, S)
    wt = W.T                  # tiny (O, C) weight transpose
    b2 = b.reshape(O, 1)      # bias column

    TS, TK, vmem_limit = _choose_tiles(S, C, O, B)
    n_s = pl.cdiv(S, TS)
    n_k = C // TK

    cost = pl.CostEstimate(
        flops=2 * B * S * C * O,
        transcendentals=0,
        bytes_accessed=4 * (B * C * S + C * O + B * O * S + O),
    )
    out_shape = jax.ShapeDtypeStruct((B, O, S), jnp.float32)

    if n_k == 1:
        grid_spec = pltpu.PrefetchScalarGridSpec(
            num_scalar_prefetch=0,
            grid=(B, n_s),
            in_specs=[
                pl.BlockSpec((1, C, TS), lambda bi, si: (bi, 0, si)),  # x slab
                pl.BlockSpec((O, C), lambda bi, si: (0, 0)),           # weight^T
                pl.BlockSpec((O, 1), lambda bi, si: (0, 0)),           # bias
            ],
            out_specs=pl.BlockSpec((1, O, TS), lambda bi, si: (bi, 0, si)),
        )
        kernel = _nin_kernel_simple
        dim_sem = ("parallel", "parallel")
    else:
        grid_spec = pltpu.PrefetchScalarGridSpec(
            num_scalar_prefetch=0,
            grid=(B, n_s, n_k),
            in_specs=[
                pl.BlockSpec((1, TK, TS), lambda bi, si, ki: (bi, ki, si)),
                pl.BlockSpec((O, TK), lambda bi, si, ki: (0, ki)),
                pl.BlockSpec((O, 1), lambda bi, si, ki: (0, 0)),
            ],
            out_specs=pl.BlockSpec((1, O, TS), lambda bi, si, ki: (bi, 0, si)),
            scratch_shapes=[pltpu.VMEM((O, TS), jnp.float32)],
        )
        kernel = _nin_kernel_acc
        dim_sem = ("parallel", "parallel", "arbitrary")

    out3 = pl.pallas_call(
        kernel,
        out_shape=out_shape,
        grid_spec=grid_spec,
        compiler_params=pltpu.CompilerParams(
            dimension_semantics=dim_sem,
            vmem_limit_bytes=int(vmem_limit),
        ),
        cost_estimate=cost,
    )(x3, wt, b2)

    return out3.reshape(B, O, H, Wd)


# ----------------------------------------------------------------------------
# Params + self-test
# ----------------------------------------------------------------------------
def init_nin_params(key, in_dim, out_dim, scale=1e-10):
    n = (in_dim + out_dim) / 2.0
    limit = float(np.sqrt(3.0 * scale / n))
    W = jax.random.uniform(
        key, (in_dim, out_dim), dtype=jnp.float32, minval=-limit, maxval=limit
    )
    b = jnp.zeros((1, out_dim, 1, 1), dtype=jnp.float32)
    return W, b


if __name__ == "__main__":
    key = jax.random.PRNGKey(0)
    k_x, k_w = jax.random.split(key)

    B, C, H, Wd = 2, 4, 16, 16
    O = 8

    x = jax.random.normal(k_x, (B, C, H, Wd), dtype=jnp.float32)
    W, b = init_nin_params(k_w, C, O)

    y = nin_forward(x, W, b)
    y = jax.block_until_ready(y)

    # Reference check against plain-JAX einsum (same semantics as the torch module).
    y_ref = jnp.einsum("bchw,co->bohw", x, W) + b
    np.testing.assert_allclose(np.asarray(y), np.asarray(y_ref), rtol=1e-5, atol=1e-6)
    assert y.shape == (B, O, H, Wd)

    print("KERNEL_OK")
</pallas_src>

<mosaic_0001>
module attributes {stable_mosaic.version = 11 : i64} {
  func.func @_nin_kernel_simple(%arg0: i32, %arg1: i32, %arg2: memref<1x4x256xf32, #tpu.memory_space<vmem>>, %arg3: memref<8x4xf32, #tpu.memory_space<vmem>>, %arg4: memref<8x1xf32, #tpu.memory_space<vmem>>, %arg5: memref<1x8x256xf32, #tpu.memory_space<vmem>>) attributes {dimension_semantics = [#tpu.dimension_semantics<parallel>, #tpu.dimension_semantics<parallel>], iteration_bounds = array<i64: 2, 1>, scalar_prefetch = 0 : i64, scratch_operands = 0 : i64, tpu.core_type = #tpu.core_type<tc>, window_params = [{transform_indices = @transform_0, window_bounds = array<i64: 1, 4, 256>}, {pipeline_mode = #tpu.pipeline_mode<synchronous>, transform_indices = @transform_1, window_bounds = array<i64: 8, 4>}, {pipeline_mode = #tpu.pipeline_mode<synchronous>, transform_indices = @transform_2, window_bounds = array<i64: 8, 1>}, {transform_indices = @transform_3, window_bounds = array<i64: 1, 8, 256>}]} {
    %c0 = arith.constant 0 : index
    %c0_0 = arith.constant 0 : index
    %0 = vector.load %arg3[%c0, %c0_0] : memref<8x4xf32, #tpu.memory_space<vmem>>, vector<8x4xf32>
    %c0_1 = arith.constant 0 : index
    %c0_2 = arith.constant 0 : index
    %c0_3 = arith.constant 0 : index
    %1 = vector.load %arg2[%c0_1, %c0_2, %c0_3] : memref<1x4x256xf32, #tpu.memory_space<vmem>>, vector<1x4x256xf32>
    %2 = vector.shape_cast %1 : vector<1x4x256xf32> to vector<4x256xf32>
    %cst = arith.constant dense<0.000000e+00> : vector<8x256xf32>
    %3 = tpu.matmul %0, %2, %cst {dimension_numbers = #tpu.dot_dimension_numbers<[1], [0], [0], [1], [0, 0, 1, 1], [], []>} : vector<8x4xf32>, vector<4x256xf32>, vector<8x256xf32> -> vector<8x256xf32>
    %c0_4 = arith.constant 0 : index
    %c0_5 = arith.constant 0 : index
    %4 = vector.load %arg4[%c0_4, %c0_5] : memref<8x1xf32, #tpu.memory_space<vmem>>, vector<8x1xf32>
    %5 = vector.broadcast %4 : vector<8x1xf32> to vector<8x256xf32>
    %6 = arith.addf %3, %5 : vector<8x256xf32>
    %c0_6 = arith.constant 0 : index
    %c0_7 = arith.constant 0 : index
    %c0_8 = arith.constant 0 : index
    %7 = vector.load %arg5[%c0_6, %c0_7, %c0_8] : memref<1x8x256xf32, #tpu.memory_space<vmem>>, vector<1x8x256xf32>
    %8 = vector.shape_cast %7 : vector<1x8x256xf32> to vector<8x256xf32>
    %9 = vector.shape_cast %6 : vector<8x256xf32> to vector<1x8x256xf32>
    tpu.vector_store %arg5[%c0_6, %c0_7, %c0_8], %9 {strides = array<i32>} : memref<1x8x256xf32, #tpu.memory_space<vmem>>, vector<1x8x256xf32>,
    return
  }
  func.func @transform_0(%arg0: i32, %arg1: i32) -> (i32, i32, i32) {
    %c0_i32 = arith.constant 0 : i32
    %c0_i32_0 = arith.constant 0 : i32
    return %arg0, %c0_i32, %arg1 : i32, i32, i32
  }
  func.func @transform_1(%arg0: i32, %arg1: i32) -> (i32, i32) {
    %c0_i32 = arith.constant 0 : i32
    %c0_i32_0 = arith.constant 0 : i32
    %c0_i32_1 = arith.constant 0 : i32
    return %c0_i32, %c0_i32_0 : i32, i32
  }
  func.func @transform_2(%arg0: i32, %arg1: i32) -> (i32, i32) {
    %c0_i32 = arith.constant 0 : i32
    %c0_i32_0 = arith.constant 0 : i32
    %c0_i32_1 = arith.constant 0 : i32
    return %c0_i32, %c0_i32_0 : i32, i32
  }
  func.func @transform_3(%arg0: i32, %arg1: i32) -> (i32, i32, i32) {
    %c0_i32 = arith.constant 0 : i32
    %c0_i32_0 = arith.constant 0 : i32
    return %arg0, %c0_i32, %arg1 : i32, i32, i32
  }
}

</mosaic_0001>

<bundles_post_ra>
// kernel: tpu_custom_call.1
= control target key start
LH: loop header
LB: loop body
LE: loop exit
PB: predicated region body
PF: predicated region fallthrough
CT: control target
= control target key end

     0   :  { %8 = vsyncpa [#allocation3], 0  ;;  %s683_s0 = inlined_call_operand.vmem [shape: f32[2,4,256], index: 0, kind: input, shape index: {}]   ;;  %s684_s1 = inlined_call_operand.vmem [shape: f32[8,4], index: 1, kind: input, shape index: {}]   ;;  %s685_s2 = inlined_call_operand.vmem [shape: f32[8,1], index: 2, kind: input, shape index: {}]   ;;  %s686_s3 = inlined_call_operand.hbm [shape: f32[2,8,256], index: 3, kind: output, shape index: {}]  }
   0x1   :  { %10 = vsyncpa [#allocation3 + $0x1], 0  ;;  %s565_s12 = smov 0   ;;  %s567_s13 = smov 0  }
   0x2   :  { %s569_s14 = smov 0   ;;  %s571_s15 = smov 0  }
   0x3   :  { %s573_s16 = smov 0   ;;  %s575_s17 = smov 0  }
   0x4 LB: > { %s385_s18 = sadd.s32 4294967295, %s540_s17   ;;  %s386_s19 = sadd.s32 4294967294, %s540_s17   ;;  %s540_s17 = sphi %s575_s17, %s16_s17   ;;  %s536_s16 = sphi %s573_s16, %s693_s16   ;;  %s532_s15 = sphi %s571_s15, %s692_s15   ;;  %s528_s14 = sphi %s569_s14, %s691_s14   ;;  %s524_s13 = sphi %s567_s13, %s690_s13   ;;  %s520_s12 = sphi %s565_s12, %s689_s12  }
   0x5   : > { %s28_s20 = sadd.s32 1, %s536_s16  ;;  %s107_s21 = sadd.s32 1, %s528_s14 }
   0x6   : > { %p30_p0 = scmp.ge.s32.totalorder %s28_s20, 2  ;;  %p117_p1 = scmp.ne.s32.totalorder %s528_s14, %s524_s13 }
   0x7   : > { %p118_p2 = scmp.eq.s32.totalorder %s385_s18, 1  ;;  %p123_p3 = scmp.ne.s32.totalorder %s524_s13, %s520_s12 }
   0x8   : > { %s695_s20 = smov (%p30_p0, %s28_s20), 0  ;;  %p124_p5 = scmp.eq.s32.totalorder %s386_s19, 1 }
   0x9   : > { %p605_p4 = por %p118_p2, %p117_p1  ;;  %s102_s23 = ssub.s32 %s536_s16, %s695_s20 }
   0xa   : > { %p389_p6 = scmp.ge.s32.totalorder %s540_s17, 1  ;;  %p105_p7 = scmp.eq.s32.totalorder %s102_s23, 0 }
   0xb   : > { %p612_p8 = por %p124_p5, %p123_p3  ;;  %p161_p9 = scmp.lt.s32.totalorder %s540_s17, 3 }
   0xc   : > { %s618_s25 = scalar_select %p105_p7, %s528_s14, %s107_s21  }
   0xd   : > { %p162_p10 = pnand %p389_p6, %p161_p9 }
   0xe   : > { %p190_p11 = scmp.lt.s32.totalorder (!%p162_p10), %s532_s15, 1  ;;  %v542_v0 = vmov (!%p162_p10), 0.0   ;;  %v543_v1 = vmov (!%p162_p10), 0   ;;  %v202_v2 = vld [vmem:[%s685_s2] sm:$0xff] (!%p162_p10)  ;;  %vm214_vm0 = vcmask (!%p162_p10), 1043456   ;;  %vm210_vm1 = vcmask (!%p162_p10), 31744  }
   0xf   : > { %165 = sbr.rel (%p162_p10) target bundleno = 260 (0x104), region = 32  ;;  %283 = vmatprep.mubr.f32.mxu0 (!%p162_p10), %v542_v0  ;;  %460 = vset.pattern.permute.xlu0 (!%p162_p10), %v543_v1  ;;  %v200_v5 = vld [vmem:[%s684_s1] sm:$0xff] (!%p162_p10)  ;;  %s186_s8 = sand.u32 (!%p162_p10), 1, %s524_s13  }
  0x10   : > { %205 = vperm.xlu0 (!%p162_p10), %460, %v202_v2   ;;  %s390_s9 = sshll.u32 (!%p162_p10), %s186_s8, 4  ;;  %s402_s10 = sshll.u32 (!%p162_p10), %s532_s15, 8 }
  0x11   : > { %s188_s11 = scalar_lea.vmem (!%p162_p10), [#allocation2], %s390_s9  ;;  %s636_s23 = scalar_lea.hbm (!%p162_p10), %s686_s3, %s402_s10 }
  0x12   : > { %s309_s18 = sshll.u32 (!%p162_p10), %s188_s11, 4  ;;  %s293_s26 = scalar_lea.sflag (!%p162_p10), [#allocation3], %s186_s8  ;;  %s638_s18 = int_to_ptr.vmem [resolvable:$true] %s309_s18 }
  0x13   : > { %s544_s27 = smov (!%p162_p10), [#allocation2]  }
  0x16   : > { %s191_s28 = scalar_select %p190_p11, %s532_s15, 1 }
  0x17   : > { %s462_s15 = scalar_lea.vmem %s638_s18, 256 }
  0x18   : > { %s401_s29 = sshll.u32 %s191_s28, 3  ;;  %p463_p12 = scmp.ne.s32.totalorder %s638_s18, %s462_s15 }
  0x19   : > { %s197_s5 = scalar_lea.vmem %s683_s0, %s401_s29  ;;  %s466_s28 = sshll.u32 %s544_s27, 4  ;;  %s467_s28 = int_to_ptr.vmem [resolvable:$false] %s466_s28 }
  0x1a   : > { %v201_v3 = vld [vmem:[%s197_s5] sm:$0xff]  ;;  %p464_p13 = pnand %p463_p12, %p605_p4  ;;  %s468_s29 = scalar_lea.vmem %s467_s28, 512 }
  0x1b   : > { %v209_v4 = vcombine.high %v201_v3, %v201_v3  ;;  %p469_p1 = scmp.lt.s32.totalorder %s638_s18, %s467_s28  ;;  %p470_p2 = scmp.lt.s32.totalorder %s468_s29, %s462_s15 }
  0x1c   : > { %p465_p0 = pneg %p464_p13 }
  0x1d   : > { %393 = vmatprep.subr.msk.mxu0 %vm214_vm0, %v209_v4  ;;  %p471_p3 = por %p470_p2, %p469_p1 }
  0x1e   : > { %394 = vmatpush1.msk.msra.mxu0 %vm214_vm0, %v201_v3 }
  0x1f   : > { %395 = vmatmul.mubr.msk.f32.vlgmr.msra.gmra.mrb[0].mxu0 %vm210_vm1, %v200_v5  ;;  %p472_p5 = pnand %p471_p3, %p465_p0 }
  0x8f   : > { %v206_v6 = vpop.permute.xlu0 %205 }
  0xf2   : > { %v285_v7 = vpop.f32.mrb[0].mxu0 }
  0xf3   : > { %v286_v8 = vadd.f32 %v285_v7, %v206_v6  ;;  %v287_v9 = vpop.f32.mrb[1].mxu0 }
  0xf4   : > { %v288_v10 = vadd.f32 %v287_v9, %v206_v6 }
  0xf5   : > { %290 = vst [vmem:[%s188_s11] sm:$0xff] %v286_v8 }
  0xf6   : > { %291 = vst [vmem:[%s188_s11 + $0x8] sm:$0xff] %v288_v10 }
  0xf7   : > { %475 = shalt.err (!%p472_p5)
}
  0xf8   : > { %s476_s30 = scalar_lea.hbm %s636_s23, 256  ;;  %s480_s6 = scalar_lea.hbm %s686_s3, 512 }
  0xf9   : > { %p477_p6 = scmp.ne.s32.totalorder %s636_s23, %s476_s30  ;;  %p481_p10 = scmp.lt.u32.totalorder %s636_s23, %s686_s3 }
  0xfa   : > { %p482_p11 = scmp.lt.u32.totalorder %s480_s6, %s476_s30  ;;  %p484_p13 = scmp.lt.u32.totalorder %s476_s30, %s636_s23 }
  0xfb   : > { %p478_p7 = pnand %p477_p6, %p605_p4 }
  0xfc   : > { %p483_p12 = por %p482_p11, %p481_p10 }
  0xfd   : > { %p479_p9 = pneg %p478_p7 }
  0xfe   : > { %p485_p0 = por %p484_p13, %p483_p12 }
 0x100   : > { %p486_p1 = pnand %p485_p0, %p479_p9 }
 0x102   : > { %489 = shalt.err (!%p486_p1)
}
 0x103   : > { %403 = dma.vmem_to_hbm [thread:$0]  (%p605_p4), %s638_s18, 256, %s636_s23, %s293_s26  }
 0x104 PF: > { %p409_p2 = scmp.ge.s32.totalorder %s540_s17, 2  ;;  %s321_s9 = sand.u32 1, %s520_s12  }
 0x105   : > { %s322_s10 = scalar_lea.sflag [#allocation3], %s321_s9 }
 0x106   : > { %p406_p3 = pnand %p409_p2, %p612_p8 }
 0x108   : > { %515 = dma.done.wait (!%p406_p3), %s322_s10, 256  }
 0x109   : > { %517 = vsyncadd (!%p406_p3), %s322_s10, 4294967040  ;;  %s16_s17 = sadd.s32 1, %s540_s17   ;;  %s689_s12 = smov %s524_s13 }
 0x10a   : > { %p13_p5 = scmp.ge.s32.totalorder %s16_s17, 4   ;;  %s690_s13 = smov %s528_s14 }
 0x10b   : > { %s691_s14 = smov %s618_s25  ;;  %s692_s15 = smov %s536_s16 }
 0x10c   : > { %s693_s16 = smov %s695_s20  ;;  %15 = sbr.rel (!%p13_p5) target bundleno = 4 (0x4), region = 67 }
 0x113   :  { %327 = vsyncpa [#allocation3], 1 }
 0x114   :  { %329 = vsyncpa [#allocation3 + $0x1], 1 }

</bundles_post_ra>
